<compile_context>
chip_gen: v5e
topology: v5e:2x2
jax: 0.10.0
libtpu: 0.0.40
codegen_flags: <defaults>
</compile_context>

<pallas_src>
import jax
import jax.numpy as jnp
from jax.experimental import pallas as pl
from jax.experimental.pallas import tpu as pltpu


def _round_up(x, m):
    return (x + m - 1) // m * m


# -----------------------------------------------------------------------------
# Pallas kernel 1: fused per-row affine (normalize) + x*255, column-tiled
# -----------------------------------------------------------------------------
def _affine_kernel(x_ref, a_ref, b_ref, o_ref, o255_ref):
    # One HBM read of x feeds two outputs: o = x*a + b (normalize), o255 = x*255.
    x = x_ref[...]
    o_ref[...] = x * a_ref[...] + b_ref[...]
    o255_ref[...] = x * 255.0


def affine_rows_fused(x2d, a_col, b_col, col_tile=2048):
    """x2d [R, C], a_col/b_col [R, 1] -> (x2d*a+b, x2d*255), both [R, C].

    The row dim uses the full array extent (allowed by the (8,128) rule), the
    column axis is tiled with a 128-aligned tile and a cdiv grid; the ragged
    tail block is masked by Pallas, so no padded copy of the image tensor is
    ever materialized.
    """
    R, C = x2d.shape
    ct = min(col_tile, _round_up(C, 128))

    out_n, out_255 = pl.pallas_call(
        _affine_kernel,
        out_shape=(
            jax.ShapeDtypeStruct((R, C), x2d.dtype),
            jax.ShapeDtypeStruct((R, C), x2d.dtype),
        ),
        grid=(pl.cdiv(C, ct),),
        in_specs=[
            pl.BlockSpec((R, ct), lambda j: (0, j)),
            pl.BlockSpec((R, 1), lambda j: (0, 0)),
            pl.BlockSpec((R, 1), lambda j: (0, 0)),
        ],
        out_specs=(
            pl.BlockSpec((R, ct), lambda j: (0, j)),
            pl.BlockSpec((R, ct), lambda j: (0, j)),
        ),
        compiler_params=pltpu.CompilerParams(
            dimension_semantics=("parallel",),
            vmem_limit_bytes=32 * 1024 * 1024,
        ),
    )(x2d, a_col, b_col)
    return out_n, out_255


# -----------------------------------------------------------------------------
# Pallas kernel 2: fused batched Linear (residual_proj x4), bf16 MXU, f32 acc
# -----------------------------------------------------------------------------
def _fused_linear_kernel(x_ref, w_ref, b_ref, o_ref):
    # x_ref: [tm, K] bf16, w_ref: [K, N] bf16, b_ref: [1, N] f32, o_ref: [tm, N] bf16
    acc = jnp.dot(x_ref[...], w_ref[...], preferred_element_type=jnp.float32)
    o_ref[...] = (acc + b_ref[...]).astype(o_ref.dtype)


def fused_linear_pallas(x, w, b, tm=512):
    """Batched linear: x [L, M, K] bf16, w [L, K, N] bf16, b [L, 1, N] f32
    -> [L, M, N] bf16.

    Grid = (L, M-tiles); N is NOT tiled so the whole [K, N] weight slab is
    resident across the (innermost) M loop and is DMA'd exactly once per layer.
    K (=2048) stays un-tiled. The M tail is handled with a cdiv grid and masked
    tail-block writes (no padded activation copy). Output is bf16 (halves HBM
    writes); accumulation stays f32 on the MXU.

    VMEM at tm=512, K=2048, N=1024 (bf16 x/w/out, f32 bias, 2x buffered):
      x 2 MiB*2 + w 4 MiB*2 + out 1 MiB*2 + bias ~8 KiB  ~= 14 MiB
    -> well under the 40 MiB limit we request (headroom even on v7x's 64 MiB).
    """
    L, M, K = x.shape
    _, _, N = w.shape
    tm = min(tm, _round_up(M, 8))
    assert K % 128 == 0 and N % 128 == 0 and tm % 8 == 0

    out = pl.pallas_call(
        _fused_linear_kernel,
        out_shape=jax.ShapeDtypeStruct((L, M, N), jnp.bfloat16),
        grid=(L, pl.cdiv(M, tm)),
        in_specs=[
            pl.BlockSpec((None, tm, K), lambda l, i: (l, i, 0)),
            pl.BlockSpec((None, K, N), lambda l, i: (l, 0, 0)),   # resident over i
            pl.BlockSpec((None, 1, N), lambda l, i: (l, 0, 0)),
        ],
        out_specs=pl.BlockSpec((None, tm, N), lambda l, i: (l, i, 0)),
        compiler_params=pltpu.CompilerParams(
            dimension_semantics=("parallel", "parallel"),
            vmem_limit_bytes=40 * 1024 * 1024,
        ),
    )(x, w, b)
    return out


# -----------------------------------------------------------------------------
# Plain-JAX glue: pose encoding -> extrinsics / intrinsics
# -----------------------------------------------------------------------------
def _quat_to_mat(q):
    # quaternion convention: (w, x, y, z), real part first.
    q = q / (jnp.linalg.norm(q, axis=-1, keepdims=True) + 1e-8)
    w, x, y, z = jnp.moveaxis(q, -1, 0)
    R = jnp.stack(
        [
            1 - 2 * (y * y + z * z), 2 * (x * y - w * z), 2 * (x * z + w * y),
            2 * (x * y + w * z), 1 - 2 * (x * x + z * z), 2 * (y * z - w * x),
            2 * (x * z - w * y), 2 * (y * z + w * x), 1 - 2 * (x * x + y * y),
        ],
        axis=-1,
    )
    return R.reshape(q.shape[:-1] + (3, 3))


def pose_encoding_to_extri_intri(pose_enc, image_size_hw):
    # pose_enc [..., 9] = [trans(3), quat(4), fov_h, fov_w]
    H, W = image_size_hw
    t = pose_enc[..., :3]
    quat = pose_enc[..., 3:7]
    fov_h = pose_enc[..., 7]
    fov_w = pose_enc[..., 8]
    R = _quat_to_mat(quat)
    extrinsics = jnp.concatenate([R, t[..., None]], axis=-1)  # [..., 3, 4]
    fy = (H / 2.0) / jnp.tan(fov_h / 2.0)
    fx = (W / 2.0) / jnp.tan(fov_w / 2.0)
    z = jnp.zeros_like(fx)
    o = jnp.ones_like(fx)
    K = jnp.stack(
        [fx, z, o * (W / 2.0),
         z, fy, o * (H / 2.0),
         z, z, o],
        axis=-1,
    ).reshape(fx.shape + (3, 3))
    return extrinsics, K


# -----------------------------------------------------------------------------
# FrontTracker (synthetic parameters, Pallas hot paths)
# -----------------------------------------------------------------------------
EMBED_DIM = 1024
AGG_DIM = 2 * EMBED_DIM          # 2048, input to residual_proj
INTERMEDIATE_LAYERS = [4, 11, 17, 23]
NUM_AGG_LAYERS = 24
PATCH_START_IDX = 5              # camera token + 4 register tokens
PATCH_SIZE = 14

IMAGE_MEAN = jnp.array([0.485, 0.456, 0.406], dtype=jnp.float32)
IMAGE_STD = jnp.array([0.229, 0.224, 0.225], dtype=jnp.float32)


def init_params(key):
    params = {}
    # residual_proj: 4 x Linear(2048, 1024), xavier_uniform weight, zero bias.
    bound = (6.0 / (AGG_DIM + EMBED_DIM)) ** 0.5
    proj_w, proj_b = [], []
    for _ in range(len(INTERMEDIATE_LAYERS)):
        key, sub = jax.random.split(key)
        w = jax.random.uniform(sub, (AGG_DIM, EMBED_DIM), jnp.float32, -bound, bound)
        proj_w.append(w)
        proj_b.append(jnp.zeros((EMBED_DIM,), jnp.float32))
    params["residual_proj_w"] = proj_w
    params["residual_proj_b"] = proj_b
    # Cast/stack weights ONCE at init time (not per forward).
    params["residual_proj_w_bf16"] = jnp.stack(proj_w, axis=0).astype(jnp.bfloat16)
    params["residual_proj_b_stack"] = jnp.stack(proj_b, axis=0).reshape(
        len(INTERMEDIATE_LAYERS), 1, EMBED_DIM
    )

    # TODO(synk): CameraHead is an iterative transformer trunk not defined in the
    # provided module; stand in with a single linear projection of the camera token.
    key, sub = jax.random.split(key)
    params["cam_w"] = jax.random.normal(sub, (AGG_DIM, 128), jnp.float32) * 0.02
    params["cam_b"] = jnp.zeros((128,), jnp.float32)
    return params


def stub_backbone_features(key, BT, P):
    # TODO(synk): base_model.backbone (DINO get_intermediate_layers) not defined;
    # synthesize (patch_tokens, class_token) per intermediate layer.
    feats = []
    for _ in INTERMEDIATE_LAYERS:
        key, k1, k2 = jax.random.split(key, 3)
        patch = jax.random.normal(k1, (BT, P, AGG_DIM), jnp.float32) * 0.1
        cls = jax.random.normal(k2, (BT, AGG_DIM), jnp.float32) * 0.1
        feats.append((patch, cls))
    return feats


def stub_aggregator(key, B, T, P):
    # TODO(synk): Aggregator (alternating frame/global attention) not defined;
    # synthesize per-layer aggregated tokens [B, T, PATCH_START_IDX + P, 2048].
    toks = []
    for _ in range(NUM_AGG_LAYERS):
        key, sub = jax.random.split(key)
        toks.append(
            jax.random.normal(sub, (B, T, PATCH_START_IDX + P, AGG_DIM), jnp.float32) * 0.1
        )
    return toks, PATCH_START_IDX


def stub_head(enhanced_features, image_14):
    # TODO(synk): base_model.head (DPT-style point/uncertainty head) not defined;
    # synthesize outputs from the Pallas-projected enhanced features.
    BT, _, H14, W14 = image_14.shape
    gh, gw = H14 // PATCH_SIZE, W14 // PATCH_SIZE
    feat = enhanced_features[-1][0]  # [BT, P, 1024] bf16 (fused Pallas residual_proj)
    pts = feat[..., :3].astype(jnp.float32).reshape(BT, gh, gw, 3)
    pts = jax.image.resize(pts, (BT, H14, W14, 3), method="linear")
    pts = jnp.transpose(pts, (0, 3, 1, 2))                      # [BT, 3, H14, W14]
    msk = jax.nn.sigmoid(feat[..., 3].astype(jnp.float32)).reshape(BT, gh, gw, 1)
    msk = jax.image.resize(msk, (BT, H14, W14, 1), method="linear")
    msk = jnp.transpose(msk, (0, 3, 1, 2))                      # [BT, 1, H14, W14]
    return pts, msk


def front_tracker_forward(images, params, stub_key):
    if images.ndim == 4:
        images = images[None]
    B, T, C, H, W = images.shape
    BT = B * T

    # ---- (images - mean)/std  AND  images*255 : single fused Pallas pass -----
    rows = BT * C
    x2d = images.reshape(rows, H * W)
    a_norm = jnp.tile(1.0 / IMAGE_STD, BT).reshape(rows, 1)
    b_norm = jnp.tile(-IMAGE_MEAN / IMAGE_STD, BT).reshape(rows, 1)
    norm2d, img255_2d = affine_rows_fused(x2d, a_norm, b_norm)
    images_n = norm2d.reshape(B, T, C, H, W)
    images_255 = img255_2d.reshape(B, T, C, H, W)  # == (x_n*std+mean)*255 exactly

    # ---- bilinear resize to multiple-of-14 resolution ------------------------
    H14, W14 = H // 14 * 14, W // 14 * 14
    # TODO(synk): F.interpolate(antialias=True, align_corners=False) approximated
    # by jax.image.resize.
    image_14 = jax.image.resize(
        images_n.reshape(BT, C, H, W), (BT, C, H14, W14), method="linear", antialias=True
    )
    P = (H14 // PATCH_SIZE) * (W14 // PATCH_SIZE)

    # ---- frozen backbone + aggregator (stubs) ---------------------------------
    k1, k2 = jax.random.split(stub_key)
    features = stub_backbone_features(k1, BT, P)
    aggregated_tokens_list, patch_start_idx = stub_aggregator(k2, B, T, P)

    # ---- residual_proj x4 fused: one bf16 Pallas matmul call ------------------
    # Build the token stack directly in bf16 (single bf16 write, no f32 re-read).
    tok_stack = jnp.stack(
        [
            aggregated_tokens_list[layer][:, :, patch_start_idx:, :]
            .reshape(BT * P, AGG_DIM)
            .astype(jnp.bfloat16)
            for layer in INTERMEDIATE_LAYERS
        ],
        axis=0,
    )                                                            # [4, BT*P, 2048] bf16
    w_stack = params["residual_proj_w_bf16"]                     # [4, 2048, 1024] bf16
    b_stack = params["residual_proj_b_stack"]                    # [4, 1, 1024] f32
    proj_all = fused_linear_pallas(tok_stack, w_stack, b_stack)  # [4, BT*P, 1024] bf16

    enhanced_features = []
    for layer_i, _ in enumerate(INTERMEDIATE_LAYERS):
        patch_feat_i = proj_all[layer_i].reshape(BT, P, EMBED_DIM)
        enhanced_features.append((patch_feat_i, features[layer_i][1]))

    predictions = {}

    # ---- camera head (stub trunk) --------------------------------------------
    # M = BT rows: too small for a dedicated pallas_call -> plain XLA dot.
    cam_tok = aggregated_tokens_list[-1][:, :, 0, :].reshape(BT, AGG_DIM)
    pose_raw = jnp.dot(cam_tok, params["cam_w"]) + params["cam_b"]
    pose_enc = pose_raw[:, :9].reshape(B, T, 9)
    pose_enc_list = [pose_enc]
    predictions["pose_enc"] = pose_enc_list[-1]

    # ---- dense head -----------------------------------------------------------
    points, mask = stub_head(enhanced_features, image_14)
    points = jnp.transpose(points, (0, 2, 3, 1))   # [BT, H14, W14, 3]
    mask = jnp.squeeze(mask, axis=1)               # [BT, H14, W14]
    # TODO(synk): base_model._remap_points not defined in module; identity remap.

    # ---- predictions['images'] -------------------------------------------------
    predictions["images"] = images_255              # second output of the fused kernel

    # ---- resize dense outputs back to (H, W) ----------------------------------
    points = jax.image.resize(
        jnp.transpose(points, (0, 3, 1, 2)), (BT, 3, H, W), method="linear", antialias=True
    )
    points = jnp.transpose(points, (0, 2, 3, 1))
    predictions["points_map"] = points
    mask = jax.image.resize(mask[:, None], (BT, 1, H, W), method="linear", antialias=True)
    predictions["unc_metric"] = jnp.squeeze(mask, axis=1)
    predictions["pose_enc_list"] = pose_enc_list

    # ---- poses_pred / intrinsics ----------------------------------------------
    # TODO(synk): original module builds poses_pred as [1, T, 4, 4] (B=1 assumption).
    poses_pred = jnp.tile(jnp.eye(4, dtype=jnp.float32)[None, None], (1, T, 1, 1))
    extri, intrs = pose_encoding_to_extri_intri(pose_enc_list[-1], (H, W))
    poses_pred = poses_pred.at[:, :, :3, :4].set(extri[:1])
    predictions["poses_pred"] = poses_pred
    predictions["intrs"] = intrs
    return predictions


# -----------------------------------------------------------------------------
if __name__ == "__main__":
    key = jax.random.PRNGKey(0)
    k_param, k_img, k_stub = jax.random.split(key, 3)

    params = init_params(k_param)

    B, T, C, H, W = 1, 2, 3, 28, 28   # small shapes; H, W multiples of 14
    images = jax.random.uniform(k_img, (B, T, C, H, W), jnp.float32)

    preds = front_tracker_forward(images, params, k_stub)
    preds = jax.tree_util.tree_map(lambda x: x.block_until_ready(), preds)

    # light sanity checks on shapes / values
    assert preds["pose_enc"].shape == (B, T, 9)
    assert preds["points_map"].shape == (B * T, H, W, 3)
    assert preds["unc_metric"].shape == (B * T, H, W)
    assert preds["images"].shape == (B, T, C, H, W)
    assert preds["poses_pred"].shape == (1, T, 4, 4)
    assert preds["intrs"].shape == (B, T, 3, 3)

    # numeric sanity: fused kernel outputs match plain-JAX references
    import numpy as np
    ref_255 = np.asarray(images) * 255.0
    np.testing.assert_allclose(np.asarray(preds["images"]), ref_255, rtol=1e-5, atol=1e-5)

    print("KERNEL_OK")
</pallas_src>

<mosaic_0001>
module attributes {stable_mosaic.version = 11 : i64} {
  func.func @_affine_kernel(%arg0: i32, %arg1: memref<6x896xf32, #tpu.memory_space<vmem>>, %arg2: memref<6x1xf32, #tpu.memory_space<vmem>>, %arg3: memref<6x1xf32, #tpu.memory_space<vmem>>, %arg4: memref<6x896xf32, #tpu.memory_space<vmem>>, %arg5: memref<6x896xf32, #tpu.memory_space<vmem>>) attributes {dimension_semantics = [#tpu.dimension_semantics<parallel>], iteration_bounds = array<i64: 1>, scalar_prefetch = 0 : i64, scratch_operands = 0 : i64, tpu.core_type = #tpu.core_type<tc>, window_params = [{transform_indices = @transform_0, window_bounds = array<i64: 6, 896>}, {pipeline_mode = #tpu.pipeline_mode<synchronous>, transform_indices = @transform_1, window_bounds = array<i64: 6, 1>}, {pipeline_mode = #tpu.pipeline_mode<synchronous>, transform_indices = @transform_2, window_bounds = array<i64: 6, 1>}, {transform_indices = @transform_3, window_bounds = array<i64: 6, 896>}, {transform_indices = @transform_4, window_bounds = array<i64: 6, 896>}]} {
    %c0 = arith.constant 0 : index
    %c0_0 = arith.constant 0 : index
    %0 = vector.load %arg1[%c0, %c0_0] : memref<6x896xf32, #tpu.memory_space<vmem>>, vector<6x896xf32>
    %c0_1 = arith.constant 0 : index
    %c0_2 = arith.constant 0 : index
    %1 = vector.load %arg2[%c0_1, %c0_2] : memref<6x1xf32, #tpu.memory_space<vmem>>, vector<6x1xf32>
    %2 = vector.broadcast %1 : vector<6x1xf32> to vector<6x896xf32>
    %3 = arith.mulf %0, %2 : vector<6x896xf32>
    %c0_3 = arith.constant 0 : index
    %c0_4 = arith.constant 0 : index
    %4 = vector.load %arg3[%c0_3, %c0_4] : memref<6x1xf32, #tpu.memory_space<vmem>>, vector<6x1xf32>
    %5 = vector.broadcast %4 : vector<6x1xf32> to vector<6x896xf32>
    %6 = arith.addf %3, %5 : vector<6x896xf32>
    %c0_5 = arith.constant 0 : index
    %c0_6 = arith.constant 0 : index
    %7 = vector.load %arg4[%c0_5, %c0_6] : memref<6x896xf32, #tpu.memory_space<vmem>>, vector<6x896xf32>
    tpu.vector_store %arg4[%c0_5, %c0_6], %6 {strides = array<i32>} : memref<6x896xf32, #tpu.memory_space<vmem>>, vector<6x896xf32>,
    %cst = arith.constant 2.550000e+02 : f32
    %8 = vector.broadcast %cst : f32 to vector<6x896xf32>
    %9 = arith.mulf %0, %8 : vector<6x896xf32>
    %c0_7 = arith.constant 0 : index
    %c0_8 = arith.constant 0 : index
    %10 = vector.load %arg5[%c0_7, %c0_8] : memref<6x896xf32, #tpu.memory_space<vmem>>, vector<6x896xf32>
    tpu.vector_store %arg5[%c0_7, %c0_8], %9 {strides = array<i32>} : memref<6x896xf32, #tpu.memory_space<vmem>>, vector<6x896xf32>,
    return
  }
  func.func @transform_0(%arg0: i32) -> (i32, i32) {
    %c0_i32 = arith.constant 0 : i32
    %c0_i32_0 = arith.constant 0 : i32
    return %c0_i32, %arg0 : i32, i32
  }
  func.func @transform_1(%arg0: i32) -> (i32, i32) {
    %c0_i32 = arith.constant 0 : i32
    %c0_i32_0 = arith.constant 0 : i32
    %c0_i32_1 = arith.constant 0 : i32
    return %c0_i32, %c0_i32_0 : i32, i32
  }
  func.func @transform_2(%arg0: i32) -> (i32, i32) {
    %c0_i32 = arith.constant 0 : i32
    %c0_i32_0 = arith.constant 0 : i32
    %c0_i32_1 = arith.constant 0 : i32
    return %c0_i32, %c0_i32_0 : i32, i32
  }
  func.func @transform_3(%arg0: i32) -> (i32, i32) {
    %c0_i32 = arith.constant 0 : i32
    %c0_i32_0 = arith.constant 0 : i32
    return %c0_i32, %arg0 : i32, i32
  }
  func.func @transform_4(%arg0: i32) -> (i32, i32) {
    %c0_i32 = arith.constant 0 : i32
    %c0_i32_0 = arith.constant 0 : i32
    return %c0_i32, %arg0 : i32, i32
  }
}

</mosaic_0001>

<bundles_post_ra>
// kernel: tpu_custom_call.1
= control target key start
LH: loop header
LB: loop body
LE: loop exit
PB: predicated region body
PF: predicated region fallthrough
CT: control target
= control target key end

     0   :  { %10 = vsyncpa [#allocation3], 0  ;;  %s246_s0 = inlined_call_operand.hbm [shape: f32[6,784], index: 0, kind: input, shape index: {}]   ;;  %s247_s1 = inlined_call_operand.vmem [shape: f32[6,1], index: 1, kind: input, shape index: {}]   ;;  %s248_s2 = inlined_call_operand.vmem [shape: f32[6,1], index: 2, kind: input, shape index: {}]   ;;  %s249_s3 = inlined_call_operand.hbm [shape: f32[6,784], index: 3, kind: output, shape index: {0}]   ;;  %s250_s4 = inlined_call_operand.hbm [shape: f32[6,784], index: 4, kind: output, shape index: {1}]  }
   0x1   :  { %11 = vsyncpa [#allocation4], 0 }
   0x2   :  { %12 = vsyncpa [#allocation7], 0  ;;  %s18_s17 = sshll.u32 %s246_s0, 4  ;;  %s202_s18 = smov [#allocation2]   ;;  %s19_s17 = int_to_ptr.hbm [resolvable:$true] %s18_s17 }
   0x3   :  { %s20_s19 = sshll.u32 %s202_s18, 4  ;;  %s21_s19 = int_to_ptr.vmem [resolvable:$true] %s20_s19 }
   0x4   :  { %23 = dma.hbm_to_vmem [thread:$0]  %s19_s17, 896, %s21_s19, [#allocation3]  }
   0x5   :  { %196 = dma.done.wait [#allocation3], 896  }
   0x6   :  { %197 = vsyncadd [#allocation3], 4294966400  ;;  %v203_v0 = vmov 0   ;;  %v39_v1 = vld [vmem:[%s247_s1] sm:$0x3f]  ;;  %s204_s0 = smov [#allocation6]  }
   0x7   :  { %123 = vset.pattern.permute.xlu0 %v203_v0  ;;  %v52_v2 = vld [vmem:[%s248_s2] sm:$0x3f]  ;;  %v33_v4 = vld [vmem:[#allocation2 + $0x8] sm:$0x3f]  ;;  %v34_v5 = vld [vmem:[#allocation2 + $0x10] sm:$0x3f] }
   0x8   :  { %42 = vperm.xlu0 %123, %v39_v1   ;;  %v32_v3 = vld [vmem:[#allocation2] sm:$0x3f]  ;;  %v35_v6 = vld [vmem:[#allocation2 + $0x18] sm:$0x3f]  ;;  %v73_v8 = vmul.f32 255.0, %v33_v4  ;;  %v74_v9 = vmul.f32 255.0, %v34_v5 }
   0x9   :  { %v72_v7 = vmul.f32 255.0, %v32_v3  ;;  %v36_v10 = vld [vmem:[#allocation2 + $0x20] sm:$0x3f]  ;;  %v75_v11 = vmul.f32 255.0, %v35_v6  ;;  %v37_v12 = vld [vmem:[#allocation2 + $0x28] sm:$0x3f] }
   0xa   :  { %v76_v13 = vmul.f32 255.0, %v36_v10  ;;  %s102_s1 = sshll.u32 %s204_s0, 4  ;;  %v38_v14 = vld [vmem:[#allocation2 + $0x30] sm:$0x3f]  ;;  %v77_v15 = vmul.f32 255.0, %v37_v12  ;;  %s104_s25 = sshll.u32 %s250_s4, 4  ;;  %s103_s1 = int_to_ptr.vmem [resolvable:$true] %s102_s1  ;;  %s105_s25 = int_to_ptr.hbm [resolvable:$true] %s104_s25 }
   0xb   :  { %79 = vst [vmem:[#allocation6] sm:$0x3f] %v72_v7  ;;  %v78_v16 = vmul.f32 255.0, %v38_v14  ;;  %s205_s4 = smov [#allocation5]   ;;  %s93_s29 = sshll.u32 %s249_s3, 4  ;;  %s94_s29 = int_to_ptr.hbm [resolvable:$true] %s93_s29 }
   0xc   :  { %80 = vst [vmem:[#allocation6 + $0x8] sm:$0x3f] %v73_v8  ;;  %s91_s26 = sshll.u32 %s205_s4, 4  ;;  %s92_s26 = int_to_ptr.vmem [resolvable:$true] %s91_s26 }
   0xd   :  { %81 = vst [vmem:[#allocation6 + $0x10] sm:$0x3f] %v74_v9 }
   0xe   :  { %82 = vst [vmem:[#allocation6 + $0x18] sm:$0x3f] %v75_v11 }
   0xf   :  { %83 = vst [vmem:[#allocation6 + $0x20] sm:$0x3f] %v76_v13 }
  0x10   :  { %55 = vperm.xlu0 %123, %v52_v2   ;;  %84 = vst [vmem:[#allocation6 + $0x28] sm:$0x3f] %v77_v15 }
  0x11   :  { %85 = vst [vmem:[#allocation6 + $0x30] sm:$0x3f] %v78_v16 }
  0x12   :  { %107 = dma.vmem_to_hbm [thread:$0]  %s103_s1, 896, %s105_s25, [#allocation7]  }
  0x7a   :  { %v43_v17 = vpop.permute.xlu0 %42 }
  0x7b   :  { %v45_v18 = vmul.f32 %v43_v17, %v32_v3  ;;  %v46_v19 = vmul.f32 %v43_v17, %v33_v4  ;;  %v47_v20 = vmul.f32 %v43_v17, %v34_v5  ;;  %v48_v22 = vmul.f32 %v43_v17, %v35_v6 }
  0x7c   :  { %v49_v23 = vmul.f32 %v43_v17, %v36_v10  ;;  %v50_v27 = vmul.f32 %v43_v17, %v37_v12  ;;  %v51_v29 = vmul.f32 %v43_v17, %v38_v14 }
  0x82   :  { %v56_v21 = vpop.permute.xlu0 %55 }
  0x83   :  { %v58_v24 = vadd.f32 %v56_v21, %v45_v18  ;;  %v59_v25 = vadd.f32 %v56_v21, %v46_v19  ;;  %v60_v26 = vadd.f32 %v56_v21, %v47_v20  ;;  %v61_v28 = vadd.f32 %v56_v21, %v48_v22 }
  0x84   :  { %v62_v30 = vadd.f32 %v56_v21, %v49_v23  ;;  %v63_v31 = vadd.f32 %v56_v21, %v50_v27  ;;  %v64_v32 = vadd.f32 %v56_v21, %v51_v29 }
  0x85   :  { %65 = vst [vmem:[#allocation5] sm:$0x3f] %v58_v24 }
  0x86   :  { %66 = vst [vmem:[#allocation5 + $0x8] sm:$0x3f] %v59_v25 }
  0x87   :  { %67 = vst [vmem:[#allocation5 + $0x10] sm:$0x3f] %v60_v26 }
  0x88   :  { %68 = vst [vmem:[#allocation5 + $0x18] sm:$0x3f] %v61_v28 }
  0x89   :  { %69 = vst [vmem:[#allocation5 + $0x20] sm:$0x3f] %v62_v30 }
  0x8a   :  { %70 = vst [vmem:[#allocation5 + $0x28] sm:$0x3f] %v63_v31 }
  0x8b   :  { %71 = vst [vmem:[#allocation5 + $0x30] sm:$0x3f] %v64_v32 }
  0x8c   :  { %96 = dma.vmem_to_hbm [thread:$0]  %s92_s26, 896, %s94_s29, [#allocation4]  }
  0x8d   :  { %198 = dma.done.wait [#allocation4], 896  }
  0x8e   :  { %199 = vsyncadd [#allocation4], 4294966400 }
  0x8f   :  { %200 = dma.done.wait [#allocation7], 896  }
  0x90   :  { %201 = vsyncadd [#allocation7], 4294966400 }
  0x91   :  { %116 = vsyncpa [#allocation3], 1 }
  0x92   :  { %117 = vsyncpa [#allocation4], 1 }
  0x93   :  { %118 = vsyncpa [#allocation7], 1 }

</bundles_post_ra>
